<compile_context>
chip_gen: v7x
topology: tpu7x:2x2x1
jax: 0.10.0
libtpu: 0.0.40
codegen_flags: <defaults>
</compile_context>

<pallas_src>
import functools

import jax
import jax.numpy as jnp
from jax.experimental import pallas as pl
from jax.experimental.pallas import tpu as pltpu

NUM_CLASSES = 19
IMAGENET_MEAN = (0.485, 0.456, 0.406)
IMAGENET_STD = (0.229, 0.224, 0.225)


def _nearest_resize(img, out_size):
    """torch.nn.functional.interpolate(mode='nearest') equivalent (reference only)."""
    n, c, h, w = img.shape
    ri = (jnp.arange(out_size) * h) // out_size
    ci = (jnp.arange(out_size) * w) // out_size
    return img[:, :, ri[:, None], ci[None, :]]


def _face_parsing_loss_kernel(w_ref, b_ref, x_ref, y_ref, m_ref, wt_ref,
                              out_ref, acc_ref, *, inv_count):
    p = pl.program_id(1)

    @pl.when(p == 0)
    def _():
        acc_ref[...] = jnp.zeros_like(acc_ref)
        out_ref[...] = jnp.zeros_like(out_ref)

    def score(img):                                     # img: (3, TP), raw [-1,1]
        # [-1,1]->[0,1] rescale and ImageNet normalize are pre-folded into w/b.
        # TODO(synk): full BiSeNet backbone (ResNet-18 + ARM/FFM) and its
        # checkpoint are unavailable; "net" is a synthetic 1x1-conv 19-class head.
        logits = jnp.dot(w_ref[...], img,
                         preferred_element_type=jnp.float32) + b_ref[...]
        mx = jnp.max(logits, axis=0, keepdims=True)     # (1, TP)
        s = jnp.sum(jnp.exp(logits - mx), axis=0, keepdims=True)
        # max(softmax(logits)) == 1 / sum(exp(logits - max(logits)))  (exact)
        return pl.reciprocal(s, approx=False)           # (1, TP)

    d = (score(x_ref[0]) - score(y_ref[0])) * m_ref[0]  # (1, TP)
    acc_ref[...] += d * d * wt_ref[...]                 # per-lane accumulation

    @pl.when(p == pl.num_programs(1) - 1)
    def _():
        total = jnp.sum(acc_ref[...]) * inv_count       # one XLU reduce / sample
        out_ref[...] = jnp.full(out_ref.shape, total, out_ref.dtype)


def face_parsing_loss(x, y, mask, w, b, *, out_size=512, tile_pixels=16384):
    """Per-sample FaceParsingLoss (is_reduce=False)."""
    n, c, h, wd = x.shape
    assert c == 3, "RGB normalization requires 3 channels"
    assert mask.shape == (n, 1, h, wd), "mask must share x/y spatial size"

    p_total = h * wd
    tp = min(tile_pixels, p_total)
    assert p_total % tp == 0 and tp % 128 == 0
    n_ptiles = p_total // tp

    mean = jnp.array(IMAGENET_MEAN, jnp.float32)
    std = jnp.array(IMAGENET_STD, jnp.float32)
    # Fold the [-1,1]->[0,1] rescale + ImageNet normalization into the 1x1 conv:
    #   logits = w @ ((img+1)*0.5 - mean)/std + b  ==  w_f @ img + b_f
    w_f = (w * (0.5 / std)[None, :]).astype(jnp.float32)
    b_f = (b + (w @ ((0.5 - mean) / std))[:, None]).astype(jnp.float32)

    # Nearest upsampling to (S,S) only duplicates source pixels; compute each
    # score once per source pixel and weight its squared error by how many
    # output pixels map to it (exact; avoids materializing (N,3,S,S) in HBM).
    cnt_r = jnp.bincount((jnp.arange(out_size) * h) // out_size, length=h)
    cnt_c = jnp.bincount((jnp.arange(out_size) * wd) // out_size, length=wd)
    wt = (cnt_r[:, None] * cnt_c[None, :]).astype(jnp.float32).reshape(1, p_total)

    xr = x.reshape(n, 3, p_total).astype(jnp.float32)
    yr = y.reshape(n, 3, p_total).astype(jnp.float32)
    mr = mask.reshape(n, 1, p_total).astype(jnp.float32)

    kernel = functools.partial(_face_parsing_loss_kernel,
                               inv_count=1.0 / float(out_size * out_size))

    out = pl.pallas_call(
        kernel,
        out_shape=jax.ShapeDtypeStruct((n, 1, 128), jnp.float32),
        grid_spec=pltpu.PrefetchScalarGridSpec(
            num_scalar_prefetch=0,
            grid=(n, n_ptiles),
            in_specs=[
                pl.BlockSpec((NUM_CLASSES, 3), lambda i, p: (0, 0)),   # folded w
                pl.BlockSpec((NUM_CLASSES, 1), lambda i, p: (0, 0)),   # folded b
                pl.BlockSpec((1, 3, tp), lambda i, p: (i, 0, p)),      # x pixels
                pl.BlockSpec((1, 3, tp), lambda i, p: (i, 0, p)),      # y pixels
                pl.BlockSpec((1, 1, tp), lambda i, p: (i, 0, p)),      # mask
                pl.BlockSpec((1, tp), lambda i, p: (0, p)),            # dup weights
            ],
            out_specs=pl.BlockSpec((1, 1, 128), lambda i, p: (i, 0, 0)),
            scratch_shapes=[pltpu.VMEM((1, tp), jnp.float32)],         # per-lane acc
        ),
        compiler_params=pltpu.CompilerParams(
            dimension_semantics=("parallel", "arbitrary")),
    )(w_f, b_f, xr, yr, mr, wt)

    return out[:, 0, 0]                                 # (N,) per-sample loss


def _reference(x, y, mask, w, b, out_size):
    """Pure-JAX reference (explicit resize path) for correctness checking."""
    mean = jnp.array(IMAGENET_MEAN, jnp.float32).reshape(1, 3, 1, 1)
    std = jnp.array(IMAGENET_STD, jnp.float32).reshape(1, 3, 1, 1)

    def score(img):
        img01 = (img + 1.0) * 0.5
        imgn = (img01 - mean) / std
        logits = jnp.einsum('oc,nchw->nohw', w, imgn) + b.reshape(1, -1, 1, 1)
        sm = jax.nn.softmax(logits, axis=1)
        return jnp.max(sm, axis=1, keepdims=True)

    xr = _nearest_resize(x, out_size)
    yr = _nearest_resize(y, out_size)
    mr = _nearest_resize(mask, out_size)
    d = score(xr) * mr - score(yr) * mr
    return jnp.mean(d * d, axis=(1, 2, 3))


if __name__ == "__main__":
    key = jax.random.PRNGKey(0)
    kx, ky, km, kw, kb = jax.random.split(key, 5)

    N, C, H, W = 2, 3, 16, 16         # C must be 3 (RGB normalization)
    OUT_SIZE = 64                     # module uses 512; kept small for demo

    x = jax.random.uniform(kx, (N, C, H, W), jnp.float32, minval=-1.0, maxval=1.0)
    y = jax.random.uniform(ky, (N, C, H, W), jnp.float32, minval=-1.0, maxval=1.0)
    mask = (jax.random.uniform(km, (N, 1, H, W)) > 0.5).astype(jnp.float32)

    # Deterministic synthetic "segmentation net" parameters (1x1 conv, 19 classes).
    w = jax.random.normal(kw, (NUM_CLASSES, 3), jnp.float32) * 0.5
    b = jax.random.normal(kb, (NUM_CLASSES, 1), jnp.float32) * 0.1

    loss = face_parsing_loss(x, y, mask, w, b, out_size=OUT_SIZE)
    loss = jax.block_until_ready(loss)

    ref = _reference(x, y, mask, w, b, OUT_SIZE)
    assert loss.shape == (N,)
    assert jnp.allclose(loss, ref, rtol=1e-3, atol=1e-5), (loss, ref)

    print("KERNEL_OK")
</pallas_src>

<mosaic_0001>
module attributes {stable_mosaic.version = 11 : i64} {
  func.func @_face_parsing_loss_kernel(%arg0: i32, %arg1: i32, %arg2: memref<19x3xf32, #tpu.memory_space<vmem>>, %arg3: memref<19x1xf32, #tpu.memory_space<vmem>>, %arg4: memref<1x3x256xf32, #tpu.memory_space<vmem>>, %arg5: memref<1x3x256xf32, #tpu.memory_space<vmem>>, %arg6: memref<1x1x256xf32, #tpu.memory_space<vmem>>, %arg7: memref<1x256xf32, #tpu.memory_space<vmem>>, %arg8: memref<1x1x128xf32, #tpu.memory_space<vmem>>, %arg9: memref<1x256xf32, #tpu.memory_space<vmem>>) attributes {dimension_semantics = [#tpu.dimension_semantics<parallel>, #tpu.dimension_semantics<arbitrary>], iteration_bounds = array<i64: 2, 1>, scalar_prefetch = 0 : i64, scratch_operands = 1 : i64, tpu.core_type = #tpu.core_type<tc>, window_params = [{pipeline_mode = #tpu.pipeline_mode<synchronous>, transform_indices = @transform_0, window_bounds = array<i64: 19, 3>}, {pipeline_mode = #tpu.pipeline_mode<synchronous>, transform_indices = @transform_1, window_bounds = array<i64: 19, 1>}, {transform_indices = @transform_2, window_bounds = array<i64: 1, 3, 256>}, {transform_indices = @transform_3, window_bounds = array<i64: 1, 3, 256>}, {transform_indices = @transform_4, window_bounds = array<i64: 1, 1, 256>}, {transform_indices = @transform_5, window_bounds = array<i64: 1, 256>}, {transform_indices = @transform_6, window_bounds = array<i64: 1, 1, 128>}]} {
    %c0_i32 = arith.constant 0 : i32
    %0 = arith.cmpi eq, %arg1, %c0_i32 : i32
    %1 = arith.extui %0 : i1 to i32
    %c0_i32_0 = arith.constant 0 : i32
    %2 = arith.cmpi ne, %1, %c0_i32_0 : i32
    scf.if %2 {
      %cst_30 = arith.constant 0.000000e+00 : f32
      %46 = vector.broadcast %cst_30 : f32 to vector<1x256xf32>
      %c0_31 = arith.constant 0 : index
      %c0_32 = arith.constant 0 : index
      %47 = vector.load %arg9[%c0_31, %c0_32] : memref<1x256xf32, #tpu.memory_space<vmem>>, vector<1x256xf32>
      tpu.vector_store %arg9[%c0_31, %c0_32], %46 {strides = array<i32>} : memref<1x256xf32, #tpu.memory_space<vmem>>, vector<1x256xf32>,
      %cst_33 = arith.constant 0.000000e+00 : f32
      %48 = vector.broadcast %cst_33 : f32 to vector<1x1x128xf32>
      %c0_34 = arith.constant 0 : index
      %c0_35 = arith.constant 0 : index
      %c0_36 = arith.constant 0 : index
      %49 = vector.load %arg8[%c0_34, %c0_35, %c0_36] : memref<1x1x128xf32, #tpu.memory_space<vmem>>, vector<1x1x128xf32>
      tpu.vector_store %arg8[%c0_34, %c0_35, %c0_36], %48 {strides = array<i32>} : memref<1x1x128xf32, #tpu.memory_space<vmem>>, vector<1x1x128xf32>,
    } else {
    }
    %c0 = arith.constant 0 : index
    %c0_1 = arith.constant 0 : index
    %c0_2 = arith.constant 0 : index
    %3 = vector.load %arg4[%c0, %c0_1, %c0_2] : memref<1x3x256xf32, #tpu.memory_space<vmem>>, vector<1x3x256xf32>
    %4 = vector.shape_cast %3 : vector<1x3x256xf32> to vector<3x256xf32>
    %c0_3 = arith.constant 0 : index
    %c0_4 = arith.constant 0 : index
    %5 = vector.load %arg2[%c0_3, %c0_4] : memref<19x3xf32, #tpu.memory_space<vmem>>, vector<19x3xf32>
    %cst = arith.constant dense<0.000000e+00> : vector<19x256xf32>
    %6 = tpu.matmul %5, %4, %cst {dimension_numbers = #tpu.dot_dimension_numbers<[1], [0], [0], [1], [0, 0, 1, 1], [], []>} : vector<19x3xf32>, vector<3x256xf32>, vector<19x256xf32> -> vector<19x256xf32>
    %c0_5 = arith.constant 0 : index
    %c0_6 = arith.constant 0 : index
    %7 = vector.load %arg3[%c0_5, %c0_6] : memref<19x1xf32, #tpu.memory_space<vmem>>, vector<19x1xf32>
    %8 = vector.broadcast %7 : vector<19x1xf32> to vector<19x256xf32>
    %9 = arith.addf %6, %8 : vector<19x256xf32>
    %cst_7 = arith.constant dense<0xFF800000> : vector<256xf32>
    %10 = vector.multi_reduction <maximumf>, %9, %cst_7 [0] : vector<19x256xf32> to vector<256xf32>
    %11 = vector.shape_cast %10 : vector<256xf32> to vector<1x256xf32>
    %12 = vector.broadcast %11 : vector<1x256xf32> to vector<19x256xf32>
    %13 = arith.subf %9, %12 : vector<19x256xf32>
    %14 = math.exp %13 : vector<19x256xf32>
    %cst_8 = arith.constant dense<0.000000e+00> : vector<256xf32>
    %15 = vector.multi_reduction <add>, %14, %cst_8 [0] : vector<19x256xf32> to vector<256xf32>
    %16 = vector.shape_cast %15 : vector<256xf32> to vector<1x256xf32>
    %17 = tpu.reciprocal %16 : vector<1x256xf32> -> vector<1x256xf32>
    %c0_9 = arith.constant 0 : index
    %c0_10 = arith.constant 0 : index
    %c0_11 = arith.constant 0 : index
    %18 = vector.load %arg5[%c0_9, %c0_10, %c0_11] : memref<1x3x256xf32, #tpu.memory_space<vmem>>, vector<1x3x256xf32>
    %19 = vector.shape_cast %18 : vector<1x3x256xf32> to vector<3x256xf32>
    %c0_12 = arith.constant 0 : index
    %c0_13 = arith.constant 0 : index
    %20 = vector.load %arg2[%c0_12, %c0_13] : memref<19x3xf32, #tpu.memory_space<vmem>>, vector<19x3xf32>
    %cst_14 = arith.constant dense<0.000000e+00> : vector<19x256xf32>
    %21 = tpu.matmul %20, %19, %cst_14 {dimension_numbers = #tpu.dot_dimension_numbers<[1], [0], [0], [1], [0, 0, 1, 1], [], []>} : vector<19x3xf32>, vector<3x256xf32>, vector<19x256xf32> -> vector<19x256xf32>
    %c0_15 = arith.constant 0 : index
    %c0_16 = arith.constant 0 : index
    %22 = vector.load %arg3[%c0_15, %c0_16] : memref<19x1xf32, #tpu.memory_space<vmem>>, vector<19x1xf32>
    %23 = vector.broadcast %22 : vector<19x1xf32> to vector<19x256xf32>
    %24 = arith.addf %21, %23 : vector<19x256xf32>
    %cst_17 = arith.constant dense<0xFF800000> : vector<256xf32>
    %25 = vector.multi_reduction <maximumf>, %24, %cst_17 [0] : vector<19x256xf32> to vector<256xf32>
    %26 = vector.shape_cast %25 : vector<256xf32> to vector<1x256xf32>
    %27 = vector.broadcast %26 : vector<1x256xf32> to vector<19x256xf32>
    %28 = arith.subf %24, %27 : vector<19x256xf32>
    %29 = math.exp %28 : vector<19x256xf32>
    %cst_18 = arith.constant dense<0.000000e+00> : vector<256xf32>
    %30 = vector.multi_reduction <add>, %29, %cst_18 [0] : vector<19x256xf32> to vector<256xf32>
    %31 = vector.shape_cast %30 : vector<256xf32> to vector<1x256xf32>
    %32 = tpu.reciprocal %31 : vector<1x256xf32> -> vector<1x256xf32>
    %33 = arith.subf %17, %32 : vector<1x256xf32>
    %c0_19 = arith.constant 0 : index
    %c0_20 = arith.constant 0 : index
    %c0_21 = arith.constant 0 : index
    %34 = vector.load %arg6[%c0_19, %c0_20, %c0_21] : memref<1x1x256xf32, #tpu.memory_space<vmem>>, vector<1x1x256xf32>
    %35 = vector.shape_cast %34 : vector<1x1x256xf32> to vector<1x256xf32>
    %36 = arith.mulf %33, %35 : vector<1x256xf32>
    %c0_22 = arith.constant 0 : index
    %c0_23 = arith.constant 0 : index
    %37 = vector.load %arg9[%c0_22, %c0_23] : memref<1x256xf32, #tpu.memory_space<vmem>>, vector<1x256xf32>
    %38 = arith.mulf %36, %36 : vector<1x256xf32>
    %c0_24 = arith.constant 0 : index
    %c0_25 = arith.constant 0 : index
    %39 = vector.load %arg7[%c0_24, %c0_25] : memref<1x256xf32, #tpu.memory_space<vmem>>, vector<1x256xf32>
    %40 = arith.mulf %38, %39 : vector<1x256xf32>
    %41 = arith.addf %37, %40 : vector<1x256xf32>
    %c0_26 = arith.constant 0 : index
    %c0_27 = arith.constant 0 : index
    %42 = vector.load %arg9[%c0_26, %c0_27] : memref<1x256xf32, #tpu.memory_space<vmem>>, vector<1x256xf32>
    tpu.vector_store %arg9[%c0_26, %c0_27], %41 {strides = array<i32>} : memref<1x256xf32, #tpu.memory_space<vmem>>, vector<1x256xf32>,
    %c0_i32_28 = arith.constant 0 : i32
    %43 = arith.cmpi eq, %arg1, %c0_i32_28 : i32
    %44 = arith.extui %43 : i1 to i32
    %c0_i32_29 = arith.constant 0 : i32
    %45 = arith.cmpi ne, %44, %c0_i32_29 : i32
    scf.if %45 {
      %c0_30 = arith.constant 0 : index
      %c0_31 = arith.constant 0 : index
      %46 = vector.load %arg9[%c0_30, %c0_31] : memref<1x256xf32, #tpu.memory_space<vmem>>, vector<1x256xf32>
      %47 = vector.shape_cast %46 : vector<1x256xf32> to vector<1x1x256xf32>
      %cst_32 = arith.constant dense<0.000000e+00> : vector<1xf32>
      %48 = vector.multi_reduction <add>, %47, %cst_32 [1, 2] : vector<1x1x256xf32> to vector<1xf32>
      %49 = vector.shape_cast %48 : vector<1xf32> to vector<1x1x1xf32>
      %50 = vector.extract %49[0, 0, 0] : f32 from vector<1x1x1xf32>
      %cst_33 = arith.constant 2.44140625E-4 : f32
      %51 = arith.mulf %50, %cst_33 : f32
      %52 = vector.broadcast %51 : f32 to vector<1x1x128xf32>
      %c0_34 = arith.constant 0 : index
      %c0_35 = arith.constant 0 : index
      %c0_36 = arith.constant 0 : index
      %53 = vector.load %arg8[%c0_34, %c0_35, %c0_36] : memref<1x1x128xf32, #tpu.memory_space<vmem>>, vector<1x1x128xf32>
      tpu.vector_store %arg8[%c0_34, %c0_35, %c0_36], %52 {strides = array<i32>} : memref<1x1x128xf32, #tpu.memory_space<vmem>>, vector<1x1x128xf32>,
    } else {
    }
    return
  }
  func.func @transform_0(%arg0: i32, %arg1: i32) -> (i32, i32) {
    %c0_i32 = arith.constant 0 : i32
    %c0_i32_0 = arith.constant 0 : i32
    %c0_i32_1 = arith.constant 0 : i32
    return %c0_i32, %c0_i32_0 : i32, i32
  }
  func.func @transform_1(%arg0: i32, %arg1: i32) -> (i32, i32) {
    %c0_i32 = arith.constant 0 : i32
    %c0_i32_0 = arith.constant 0 : i32
    %c0_i32_1 = arith.constant 0 : i32
    return %c0_i32, %c0_i32_0 : i32, i32
  }
  func.func @transform_2(%arg0: i32, %arg1: i32) -> (i32, i32, i32) {
    %c0_i32 = arith.constant 0 : i32
    %c0_i32_0 = arith.constant 0 : i32
    return %arg0, %c0_i32, %arg1 : i32, i32, i32
  }
  func.func @transform_3(%arg0: i32, %arg1: i32) -> (i32, i32, i32) {
    %c0_i32 = arith.constant 0 : i32
    %c0_i32_0 = arith.constant 0 : i32
    return %arg0, %c0_i32, %arg1 : i32, i32, i32
  }
  func.func @transform_4(%arg0: i32, %arg1: i32) -> (i32, i32, i32) {
    %c0_i32 = arith.constant 0 : i32
    %c0_i32_0 = arith.constant 0 : i32
    return %arg0, %c0_i32, %arg1 : i32, i32, i32
  }
  func.func @transform_5(%arg0: i32, %arg1: i32) -> (i32, i32) {
    %c0_i32 = arith.constant 0 : i32
    %c0_i32_0 = arith.constant 0 : i32
    return %c0_i32, %arg1 : i32, i32
  }
  func.func @transform_6(%arg0: i32, %arg1: i32) -> (i32, i32, i32) {
    %c0_i32 = arith.constant 0 : i32
    %c0_i32_0 = arith.constant 0 : i32
    %c0_i32_1 = arith.constant 0 : i32
    return %arg0, %c0_i32, %c0_i32_0 : i32, i32, i32
  }
}

</mosaic_0001>

<bundles_post_ra>
// kernel: tpu_custom_call.1
= control target key start
LH: loop header
LB: loop body
LE: loop exit
PB: predicated region body
PF: predicated region fallthrough
CT: control target
= control target key end

     0   :  { %11 = vsyncpa [#allocation4], 0  ;;  %s1373_s0 = inlined_call_operand.vmem [shape: f32[19,3], index: 0, kind: input, shape index: {}]   ;;  %s1374_s1 = inlined_call_operand.vmem [shape: f32[19,1], index: 1, kind: input, shape index: {}]   ;;  %s1375_s2 = inlined_call_operand.vmem [shape: f32[2,3,256], index: 2, kind: input, shape index: {}]   ;;  %s1376_s3 = inlined_call_operand.vmem [shape: f32[2,3,256], index: 3, kind: input, shape index: {}]   ;;  %s1377_s4 = inlined_call_operand.vmem [shape: f32[2,1,256], index: 4, kind: input, shape index: {}]   ;;  %s1378_s5 = inlined_call_operand.vmem [shape: f32[1,256], index: 5, kind: input, shape index: {}]   ;;  %s1379_s6 = inlined_call_operand.hbm [shape: f32[2,1,128], index: 6, kind: output, shape index: {}]  }
   0x1   :  { %13 = vsyncpa [#allocation4 + $0x1], 0  ;;  %s1155_s21 = smov 0   ;;  %s1157_s22 = smov 0  }
   0x2   :  { %s1159_s23 = smov 0   ;;  %s1161_s24 = smov 0  }
   0x3   :  { %s1163_s25 = smov 0   ;;  %s1165_s26 = smov 0  }
   0x4 LB: > { %s914_s27 = sadd.s32 4294967295, %s1114_s26   ;;  %s915_s28 = sadd.s32 4294967294, %s1114_s26   ;;  %s1114_s26 = sphi %s1165_s26, %s19_s26   ;;  %s1110_s25 = sphi %s1163_s25, %s1388_s25   ;;  %s1106_s24 = sphi %s1161_s24, %s1387_s24   ;;  %s1102_s23 = sphi %s1159_s23, %s1386_s23   ;;  %s1098_s22 = sphi %s1157_s22, %s1385_s22   ;;  %s1094_s21 = sphi %s1155_s21, %s1384_s21  }
   0x5   : > { %s31_s29 = sadd.s32 1, %s1110_s25  ;;  %s190_s30 = sadd.s32 1, %s1102_s23 }
   0x6   : > { %p33_p0 = scmp.ge.s32.totalorder %s31_s29, 2  ;;  %p200_p1 = scmp.ne.s32.totalorder %s1102_s23, %s1098_s22 }
   0x7   : > { %p201_p2 = scmp.eq.s32.totalorder %s914_s27, 1  ;;  %p206_p3 = scmp.ne.s32.totalorder %s1098_s22, %s1094_s21 }
   0x8   : > { %s1390_s29 = smov (%p33_p0, %s31_s29), 0  ;;  %p207_p5 = scmp.eq.s32.totalorder %s915_s28, 1 }
   0x9   : > { %p1195_p4 = por %p201_p2, %p200_p1  ;;  %s187_s8 = ssub.s32 %s1110_s25, %s1390_s29 }
   0xa   : > { %p919_p6 = scmp.ge.s32.totalorder %s1114_s26, 1  ;;  %p188_p7 = scmp.eq.s32.totalorder %s187_s8, 0 }
   0xb   : > { %p1202_p8 = por %p207_p5, %p206_p3  ;;  %p277_p9 = scmp.lt.s32.totalorder %s1114_s26, 3 }
   0xc   : > { %s1208_s10 = scalar_select %p188_p7, %s1102_s23, %s190_s30  }
   0xd   : > { %p278_p10 = pnand %p919_p6, %p277_p9 }
   0xe   : > { %p332_p11 = scmp.lt.s32.totalorder (!%p278_p10), %s1106_s24, 1  ;;  %v1116_v0 = vmov (!%p278_p10), 0.0   ;;  %v381_v1 = vld [vmem:[%s1374_s1 + $0x10] sm:$0x7] (!%p278_p10)  ;;  %v1117_v2 = vmov (!%p278_p10), 0   ;;  %v380_v3 = vld [vmem:[%s1374_s1 + $0x8] sm:$0xff] (!%p278_p10)  ;;  %v369_v12 = vlaneseq (!%p278_p10) }
   0xf   : > { %281 = sbr.rel (%p278_p10) target bundleno = 572 (0x23c), region = 44  ;;  %478 = vmatprep.mubr.f32.mxu0 (!%p278_p10), %v1116_v0  ;;  %624 = vmatprep.mubr.f32.mxu1 (!%p278_p10), %v1116_v0  ;;  %v379_v4 = vld [vmem:[%s1374_s1] sm:$0xff] (!%p278_p10)  ;;  %vm409_vm0 = vcmask (!%p278_p10), 1042432   ;;  %vm399_vm1 = vcmask (!%p278_p10), 23552   ;;  %v377_v10 = vld [vmem:[%s1373_s0 + $0x8] sm:$0xff] (!%p278_p10)  ;;  %vm771_vm3 = vcmask (!%p278_p10), 1040384  }
  0x10   : > { %1000 = vset.pattern.permute.xlu0 (!%p278_p10), %v1117_v2  ;;  %1001 = vset.pattern.permute.xlu1 (!%p278_p10), %v1117_v2  ;;  %v376_v9 = vld [vmem:[%s1373_s0] sm:$0xff] (!%p278_p10)  ;;  %v378_v11 = vld [vmem:[%s1373_s0 + $0x10] sm:$0x7] (!%p278_p10)  ;;  %vm1256_vm2 = vcmp.lt.s32.totalorder (!%p278_p10), %v369_v12, 256  ;;  %v1266_v14 = vshrl.u32 (!%p278_p10), %v369_v12, 7  ;;  %s329_s30 = sand.u32 (!%p278_p10), 1, %s1098_s22  }
  0x11   : > { %394 = vperm.xlu0 (!%p278_p10), %1000, %v381_v1   ;;  %389 = vperm.xlu1 (!%p278_p10), %1001, %v380_v3   ;;  %373 = vst.msk [vmem:[#allocation2] sm:$0x3] (!%p278_p10), %vm1256_vm2, %v1116_v0  ;;  %s935_s11 = sshll.u32 (!%p278_p10), %s1106_s24, 4  ;;  %s788_s19 = scalar_lea.sflag (!%p278_p10), [#allocation4], %s329_s30 }
  0x12   : > { %v1271_v16 = vsub.s32 (!%p278_p10), 0, %v1266_v14  ;;  %v1274_v17 = vsub.s32 (!%p278_p10), 1, %v1266_v14 }
  0x15   : > { %384 = vperm.xlu0 (!%p278_p10), %1000, %v379_v4  }
  0x16   : > { %s1217_s13 = scalar_select %p332_p11, %s1106_s24, 1 }
  0x17   : > { %s1119_s24 = smov [#allocation3]  }
  0x18   : > { %s938_s16 = sshll.u32 %s1217_s13, 3  ;;  %s924_s18 = sshll.u32 %s1217_s13, 1 }
  0x19   : > { %s339_s27 = scalar_lea.vmem %s1375_s2, %s938_s16  ;;  %s349_s8 = scalar_lea.vmem %s1376_s3, %s938_s16 }
  0x1a   : > { %v375_v5 = vld [vmem:[%s339_s27] sm:$0x77]  ;;  %s358_s27 = scalar_lea.vmem %s1377_s4, %s924_s18  ;;  %s1326_s18 = scalar_lea.hbm %s1379_s6, %s935_s11 }
  0x1b   : > { %v398_v6 = vcombine.high %v375_v5, %v375_v5  ;;  %v553_v7 = vld [vmem:[%s349_s8] sm:$0x77]  ;;  %s330_s8 = scalar_lea.vmem [#allocation3], %s329_s30 }
  0x1c   : > { %v555_v8 = vcombine.high %v553_v7, %v553_v7  ;;  %v1268_v15 = vld [vmem:[%s358_s27] sm:$0x3]  ;;  %374 = vst [vmem:[%s330_s8] sm:$0x1] %v1116_v0  ;;  %s800_s12 = sshll.u32 %s330_s8, 4  ;;  %s1040_s27 = sshll.u32 %s1119_s24, 4  ;;  %s1328_s12 = int_to_ptr.vmem [resolvable:$true] %s800_s12  ;;  %s1041_s27 = int_to_ptr.vmem [resolvable:$false] %s1040_s27 }
  0x1d   : > { %925 = vmatprep.subr.msk.mxu0 %vm409_vm0, %v398_v6  ;;  %v706_v18 = vrot.slane %v1268_v15, %v1271_v16  ;;  %v710_v19 = vrot.slane %v1268_v15, %v1274_v17  ;;  %s1036_s20 = scalar_lea.vmem %s1328_s12, 16  ;;  %s1042_s13 = scalar_lea.vmem %s1041_s27, 32 }
  0x1e   : > { %930 = vmatprep.subr.msk.mxu1 %vm409_vm0, %v555_v8  ;;  %926 = vmatpush1.msk.msra.mxu0 %vm409_vm0, %v375_v5  ;;  %p1037_p12 = scmp.ne.s32.totalorder %s1328_s12, %s1036_s20  ;;  %p1043_p1 = scmp.lt.s32.totalorder %s1328_s12, %s1041_s27 }
  0x1f   : > { %931 = vmatpush1.msk.msra.mxu1 %vm409_vm0, %v553_v7  ;;  %927 = vmatmul.mubr.msk.f32.vlgmr.msra.gmra.mrb[0].mxu0 %vm399_vm1, %v376_v9  ;;  %p1044_p2 = scmp.lt.s32.totalorder %s1042_s13, %s1036_s20 }
  0x20   : > { %932 = vmatmul.mubr.msk.f32.vlgmr.msra.gmra.mrb[0].mxu1 %vm399_vm1, %v376_v9  ;;  %484 = vmatprep.mubr.f32.mxu0 %v1116_v0  ;;  %p1038_p13 = pnand %p1037_p12, %p1195_p4 }
  0x21   : > { %630 = vmatprep.mubr.f32.mxu1 %v1116_v0  ;;  %p1045_p3 = por %p1044_p2, %p1043_p1 }
  0x22   : > { %p1039_p0 = pneg %p1038_p13 }
  0x23   : > { %928 = vmatmul.mubr.msk.f32.gmra.mrb[2].mxu0 %vm399_vm1, %v377_v10 }
  0x24   : > { %933 = vmatmul.mubr.msk.f32.gmra.mrb[2].mxu1 %vm399_vm1, %v377_v10  ;;  %490 = vmatprep.mubr.f32.mxu0 %v1116_v0  ;;  %p1046_p5 = pnand %p1045_p3, %p1039_p0 }
  0x25   : > { %636 = vmatprep.mubr.f32.mxu1 %v1116_v0 }
  0x27   : > { %929 = vmatmul.mubr.msk.f32.gmra.mrb[4].mxu0 %vm399_vm1, %v378_v11 }
  0x28   : > { %934 = vmatmul.mubr.msk.f32.gmra.mrb[4].mxu1 %vm399_vm1, %v378_v11 }
  0x90   : > { %v395_v20 = vpop.permute.xlu0 %394  ;;  %v390_v30 = vpop.permute.xlu1 %389 }
  0x94   : > { %v385_v28 = vpop.permute.xlu0 %384 }
  0xf2   : > { %v480_v21 = vpop.f32.mrb[0].mxu0 }
  0xf3   : > { %v626_v22 = vpop.f32.mrb[0].mxu1  ;;  %v482_v23 = vpop.f32.mrb[1].mxu0  ;;  %v481_v32 = vadd.f32 %v480_v21, %v385_v28 }
  0xf4   : > { %v628_v24 = vpop.f32.mrb[1].mxu1  ;;  %v627_v36 = vadd.f32 %v626_v22, %v385_v28  ;;  %v1280_v37 = vadd.f32 %v482_v23, %v385_v28 }
  0xf5   : > { %v1284_v41 = vadd.f32 %v628_v24, %v385_v28 }
  0xf6   : > { %v486_v25 = vpop.f32.mrb[2].mxu0 }
  0xf7   : > { %v632_v26 = vpop.f32.mrb[2].mxu1  ;;  %v488_v27 = vpop.f32.mrb[3].mxu0  ;;  %v487_v42 = vadd.f32 %v486_v25, %v390_v30 }
  0xf8   : > { %v634_v29 = vpop.f32.mrb[3].mxu1  ;;  %v633_v45 = vadd.f32 %v632_v26, %v390_v30  ;;  %v489_v49 = vadd.f32 %v488_v27, %v390_v30 }
  0xf9   : > { %v635_v53 = vadd.f32 %v634_v29, %v390_v30 }
  0xfa   : > { %v492_v31 = vpop.f32.mrb[4].mxu0 }
  0xfb   : > { %v493_v33 = vadd.f32 %v492_v31, %v395_v20  ;;  %v638_v34 = vpop.f32.mrb[4].mxu1  ;;  %v494_v35 = vpop.f32.mrb[5].mxu0 }
  0xfc   : > { %v639_v38 = vadd.f32 %v638_v34, %v395_v20  ;;  %v1282_v39 = vadd.f32 %v494_v35, %v395_v20  ;;  %v640_v40 = vpop.f32.mrb[5].mxu1 }
  0xfd   : > { %v497_v43 = vsel %vm409_vm0, %v493_v33, -inf  ;;  %v1287_v44 = vadd.f32 %v640_v40, %v395_v20 }
  0xfe   : > { %v498_v46 = vmax.f32 %v481_v32, %v497_v43  ;;  %v643_v47 = vsel %vm409_vm0, %v639_v38, -inf  ;;  %v506_v48 = vsel %vm409_vm0, %v1282_v39, -inf }
  0xff   : > { %v644_v50 = vmax.f32 %v627_v36, %v643_v47  ;;  %v507_v51 = vmax.f32 %v1280_v37, %v506_v48  ;;  %v652_v52 = vsel %vm409_vm0, %v1287_v44, -inf }
 0x100   : > { %v499_v54 = vmax.f32 %v498_v46, %v487_v42  ;;  %v653_v55 = vmax.f32 %v1284_v41, %v652_v52 }
 0x101   : > { %v645_v56 = vmax.f32 %v644_v50, %v633_v45  ;;  %v508_v57 = vmax.f32 %v507_v51, %v489_v49 }
 0x102   : > { %v500_v58 = vrot.slane %v499_v54, 4  ;;  %v654_v59 = vmax.f32 %v653_v55, %v635_v53 }
 0x103   : > { %v646_v60 = vrot.slane %v645_v56, 4  ;;  %v509_v61 = vrot.slane %v508_v57, 4 }
 0x104   : > { %v501_v62 = vmax.f32 %v499_v54, %v500_v58  ;;  %v655_v63 = vrot.slane %v654_v59, 4 }
 0x105   : > { %v647_v1 = vmax.f32 %v645_v56, %v646_v60  ;;  %v510_v2 = vmax.f32 %v508_v57, %v509_v61 }
 0x106   : > { %v502_v3 = vrot.slane %v501_v62, 2  ;;  %v656_v4 = vmax.f32 %v654_v59, %v655_v63 }
 0x107   : > { %v648_v5 = vrot.slane %v647_v1, 2  ;;  %v511_v6 = vrot.slane %v510_v2, 2 }
 0x108   : > { %v503_v7 = vmax.f32 %v501_v62, %v502_v3  ;;  %v657_v8 = vrot.slane %v656_v4, 2 }
 0x109   : > { %v649_v9 = vmax.f32 %v647_v1, %v648_v5  ;;  %v512_v10 = vmax.f32 %v510_v2, %v511_v6 }
 0x10a   : > { %v504_v11 = vrot.slane %v503_v7, 1  ;;  %v658_v12 = vmax.f32 %v656_v4, %v657_v8 }
 0x10b   : > { %v650_v20 = vrot.slane %v649_v9, 1  ;;  %v513_v21 = vrot.slane %v512_v10, 1 }
 0x10c   : > { %v505_v22 = vmax.f32 %v503_v7, %v504_v11  ;;  %v659_v23 = vrot.slane %v658_v12, 1 }
 0x10d   : > { %v651_v24 = vmax.f32 %v649_v9, %v650_v20  ;;  %v514_v25 = vmax.f32 %v512_v10, %v513_v21 }
 0x10e   : > { %v515_v26 = vsub.f32 %v481_v32, %v505_v22  ;;  %v517_v27 = vsub.f32 %v487_v42, %v505_v22  ;;  %v519_v28 = vsub.f32 %v493_v33, %v505_v22  ;;  %v660_v29 = vmax.f32 %v658_v12, %v659_v23 }
 0x10f   : > { %v661_v30 = vsub.f32 %v627_v36, %v651_v24  ;;  %v663_v31 = vsub.f32 %v633_v45, %v651_v24  ;;  %v665_v34 = vsub.f32 %v639_v38, %v651_v24  ;;  %v516_v35 = vsub.f32 %v1280_v37, %v514_v25 }
 0x110   : > { %v521_v40 = vmul.f32 1.442695, %v515_v26  ;;  %v525_v43 = vmul.f32 1.442695, %v517_v27  ;;  %v529_v46 = vmul.f32 1.442695, %v519_v28  ;;  %v518_v47 = vsub.f32 %v489_v49, %v514_v25 }
 0x111   : > { %v667_v48 = vmul.f32 1.442695, %v661_v30  ;;  %v520_v50 = vsub.f32 %v1282_v39, %v514_v25  ;;  %v671_v51 = vmul.f32 1.442695, %v663_v31  ;;  %v662_v52 = vsub.f32 %v1284_v41, %v660_v29 }
 0x112   : > { %1004 = vpow2.f32 %v521_v40  ;;  %v675_v32 = vmul.f32 1.442695, %v665_v34  ;;  %v664_v33 = vsub.f32 %v635_v53, %v660_v29  ;;  %v666_v36 = vsub.f32 %v1287_v44, %v660_v29 }
 0x113   : > { %1006 = vpow2.f32 %v525_v43  ;;  %v523_v38 = vmul.f32 1.442695, %v516_v35  ;;  %v527_v37 = vmul.f32 1.442695, %v518_v47  ;;  %v531_v42 = vmul.f32 1.442695, %v520_v50 }
 0x114   : > { %1008 = vpow2.f32 %v529_v46  ;;  %v669_v45 = vmul.f32 1.442695, %v662_v52  ;;  %v673_v49 = vmul.f32 1.442695, %v664_v33  ;;  %v677_v39 = vmul.f32 1.442695, %v666_v36 }
 0x115   : > { %1010 = vpow2.f32 %v667_v48 }
 0x116   : > { %1012 = vpow2.f32 %v671_v51 }
 0x117   : > { %1014 = vpow2.f32 %v675_v32 }
 0x118   : > { %1016 = vpow2.f32 %v523_v38  ;;  %v718_v38 = vld [vmem:[%s1378_s5] sm:$0x3] }
 0x119   : > { %1018 = vpow2.f32 %v527_v37 }
 0x11a   : > { %1020 = vpow2.f32 %v531_v42 }
 0x11b   : > { %1022 = vpow2.f32 %v669_v45  ;;  %v723_v45 = vrot.slane %v718_v38, %v1271_v16 }
 0x11c   : > { %v1005_v41 = vpop.eup %1004  ;;  %1024 = vpow2.f32 %v673_v49 }
 0x11d   : > { %v1007_v54 = vpop.eup %1006  ;;  %1026 = vpow2.f32 %v677_v39 }
 0x11e   : > { %v1009_v53 = vpop.eup %1008  ;;  %v533_v44 = vadd.f32 %v1007_v54, %v1005_v41  ;;  %v1118_v41 = vmov 1966171168  }
 0x11f   : > { %v1011_v55 = vpop.eup %1010  ;;  %v534_v56 = vsel %vm409_vm0, %v1009_v53, 0.0  ;;  %v736_v54 = vunpack.c.l.s4 %v1118_v41 }
 0x120   : > { %v1013_v57 = vpop.eup %1012  ;;  %v535_v58 = vadd.f32 %v534_v56, %v533_v44 }
 0x121   : > { %v1015_v59 = vpop.eup %1014  ;;  %v679_v60 = vadd.f32 %v1013_v57, %v1011_v55  ;;  %v727_v57 = vrot.slane %v718_v38, %v1274_v17 }
 0x122   : > { %v1017_v61 = vpop.eup %1016  ;;  %v536_v62 = vrot.slane %v535_v58, 4  ;;  %v680_v63 = vsel %vm409_vm0, %v1015_v59, 0.0 }
 0x123   : > { %v1019_v1 = vpop.eup %1018  ;;  %v681_v2 = vadd.f32 %v680_v63, %v679_v60  ;;  %v715_v63 = vld [vmem:[#allocation2] sm:$0x3] }
 0x124   : > { %v1021_v3 = vpop.eup %1020  ;;  %v537_v4 = vadd.f32 %v536_v62, %v535_v58  ;;  %v542_v5 = vadd.f32 %v1019_v1, %v1017_v61  ;;  %v737_v58 = vunpack.c.0.s8 %v736_v54 }
 0x125   : > { %v1023_v6 = vpop.eup %1022  ;;  %v682_v7 = vrot.slane %v681_v2, 4  ;;  %v543_v8 = vsel %vm409_vm0, %v1021_v3, 0.0 }
 0x126   : > { %v1025_v9 = vpop.eup %1024  ;;  %v538_v10 = vrot.slane %v537_v4, 2  ;;  %v544_v11 = vadd.f32 %v543_v8, %v542_v5 }
 0x127   : > { %v1027_v12 = vpop.eup %1026  ;;  %v683_v20 = vadd.f32 %v682_v7, %v681_v2  ;;  %v688_v21 = vadd.f32 %v1025_v9, %v1023_v6 }
 0x128   : > { %v539_v22 = vadd.f32 %v538_v10, %v537_v4  ;;  %v545_v23 = vrot.slane %v544_v11, 4  ;;  %v689_v24 = vsel %vm409_vm0, %v1027_v12, 0.0 }
 0x129   : > { %v684_v25 = vrot.slane %v683_v20, 2  ;;  %v690_v26 = vadd.f32 %v689_v24, %v688_v21 }
 0x12a   : > { %v540_v27 = vrot.slane %v539_v22, 1  ;;  %v546_v28 = vadd.f32 %v545_v23, %v544_v11 }
 0x12b   : > { %v685_v29 = vadd.f32 %v684_v25, %v683_v20  ;;  %v691_v30 = vrot.slane %v690_v26, 4 }
 0x12c   : > { %v541_v31 = vadd.f32 %v540_v27, %v539_v22  ;;  %v547_v34 = vrot.slane %v546_v28, 2 }
 0x12d   : > { %v686_v35 = vrot.slane %v685_v29, 1  ;;  %v692_v40 = vadd.f32 %v691_v30, %v690_v26 }
 0x12e   : > { %v548_v43 = vadd.f32 %v547_v34, %v546_v28  ;;  %1028 = vrcp.f32 %v541_v31 }
 0x12f   : > { %v687_v46 = vadd.f32 %v686_v35, %v685_v29  ;;  %v693_v47 = vrot.slane %v692_v40, 2 }
 0x130   : > { %v549_v48 = vrot.slane %v548_v43, 1 }
 0x131   : > { %1030 = vrcp.f32 %v687_v46  ;;  %v694_v50 = vadd.f32 %v693_v47, %v692_v40 }
 0x132   : > { %v550_v51 = vadd.f32 %v549_v48, %v548_v43 }
 0x133   : > { %v695_v52 = vrot.slane %v694_v50, 1 }
 0x134   : > { %1032 = vrcp.f32 %v550_v51 }
 0x135   : > { %v696_v32 = vadd.f32 %v695_v52, %v694_v50 }
 0x137   : > { %1034 = vrcp.f32 %v696_v32 }
 0x138   : > { %v1029_v33 = vpop.eup %1028 }
 0x13b   : > { %v1031_v36 = vpop.eup %1030 }
 0x13c   : > { %v699_v37 = vsub.f32 %v1029_v33, %v1031_v36 }
 0x13e   : > { %v713_v42 = vmul.f32 %v706_v18, %v699_v37  ;;  %v1033_v49 = vpop.eup %1032  ;;  %v740_v18 = vsub.s32 %v737_v58, %v1266_v14 }
 0x140   : > { %v716_v39 = vmul.f32 %v713_v42, %v713_v42 }
 0x141   : > { %v1035_v53 = vpop.eup %1034 }
 0x142   : > { %v700_v44 = vsub.f32 %v1033_v49, %v1035_v53  ;;  %v730_v55 = vmul.f32 %v723_v45, %v716_v39 }
 0x144   : > { %v714_v56 = vmul.f32 %v710_v19, %v700_v44 }
 0x146   : > { %v717_v59 = vmul.f32 %v714_v56, %v714_v56 }
 0x148   : > { %v731_v60 = vmul.f32 %v727_v57, %v717_v59 }
 0x14a   : > { %v734_v61 = vcombine.low %v730_v55, %v731_v60 }
 0x14c   : > { %v741_v62 = vrot.slane %v734_v61, %v740_v18 }
 0x14e   : > { %v748_v1 = vrot.slane %v741_v62, %v740_v18 }
 0x150   : > { %v750_v2 = vadd.f32 %v748_v1, %v715_v63 }
 0x152   : > { %755 = vst.msk [vmem:[#allocation2] sm:$0x3] %vm1256_vm2, %v750_v2 }
 0x159   : > { %v759_v3 = vld [vmem:[#allocation2] sm:$0x3] }
 0x15a   : > { %v764_v15 = vrot.slane %v759_v3, %v1271_v16  ;;  %v768_v19 = vrot.slane %v759_v3, %v1274_v17 }
 0x15c   : > { %v772_v4 = vsel %vm771_vm3, %v764_v15, 0.0  ;;  %v773_v5 = vsel %vm771_vm3, %v768_v19, 0.0 }
 0x15d   : > { %v774_v6 = vadd.f32 %v773_v5, %v772_v4 }
 0x15f   : > { %775 = vadd.xlane.f32.xlu1 %v774_v6 }
 0x1ec   : > { %v776_v14 = vpop.xlane.xlu1 %775 }
 0x1ed   : > { %v777_v7 = vrot.slane %v776_v14, 4 }
 0x1ef   : > { %v778_v8 = vadd.f32 %v777_v7, %v776_v14 }
 0x1f1   : > { %v779_v13 = vrot.slane %v778_v8, 2 }
 0x1f3   : > { %v780_v9 = vadd.f32 %v779_v13, %v778_v8 }
 0x1f5   : > { %v781_v10 = vrot.slane %v780_v9, 1 }
 0x1f7   : > { %v782_v11 = vadd.f32 %v781_v10, %v780_v9 }
 0x1f9   : > { %940 = vpush %v782_v11 }
 0x22a   : > { %s941_s14 = spop %940 }
 0x22b   : > { %s784_s15 = smul.f32 0.00024414063, %s941_s14 }
 0x22d   : > { %v785_v0 = vstv %s784_s15 }
 0x22e   : > { %786 = vst [vmem:[%s330_s8] sm:$0x1] %v785_v0 }
 0x22f   : > { %1049 = shalt.err (!%p1046_p5)
}
 0x230   : > { %s1050_s28 = scalar_lea.hbm %s1326_s18, 16  ;;  %s1054_s11 = scalar_lea.hbm %s1379_s6, 32 }
 0x231   : > { %p1051_p6 = scmp.ne.s32.totalorder %s1326_s18, %s1050_s28  ;;  %p1055_p10 = scmp.lt.u32.totalorder %s1326_s18, %s1379_s6 }
 0x232   : > { %p1056_p11 = scmp.lt.u32.totalorder %s1054_s11, %s1050_s28  ;;  %p1058_p13 = scmp.lt.u32.totalorder %s1050_s28, %s1326_s18 }
 0x233   : > { %p1052_p7 = pnand %p1051_p6, %p1195_p4 }
 0x234   : > { %p1057_p12 = por %p1056_p11, %p1055_p10 }
 0x235   : > { %p1053_p9 = pneg %p1052_p7 }
 0x236   : > { %p1059_p0 = por %p1058_p13, %p1057_p12 }
 0x238   : > { %p1060_p1 = pnand %p1059_p0, %p1053_p9 }
 0x23a   : > { %1063 = shalt.err (!%p1060_p1)
}
 0x23b   : > { %942 = dma.vmem_to_hbm [thread:$0]  (%p1195_p4), %s1328_s12, 16, %s1326_s18, %s788_s19  }
 0x23c PF: > { %p948_p2 = scmp.ge.s32.totalorder %s1114_s26, 2  ;;  %s812_s16 = sand.u32 1, %s1094_s21  }
 0x23d   : > { %s813_s17 = scalar_lea.sflag [#allocation4], %s812_s16 }
 0x23e   : > { %p945_p3 = pnand %p948_p2, %p1202_p8 }
 0x240   : > { %1089 = dma.done.wait (!%p945_p3), %s813_s17, 16  }
 0x241   : > { %1091 = vsyncadd (!%p945_p3), %s813_s17, 4294967280  ;;  %s19_s26 = sadd.s32 1, %s1114_s26   ;;  %s1384_s21 = smov %s1098_s22 }
 0x242   : > { %p16_p5 = scmp.ge.s32.totalorder %s19_s26, 4   ;;  %s1385_s22 = smov %s1102_s23 }
 0x243   : > { %s1386_s23 = smov %s1208_s10  ;;  %s1387_s24 = smov %s1110_s25 }
 0x244   : > { %s1388_s25 = smov %s1390_s29  ;;  %18 = sbr.rel (!%p16_p5) target bundleno = 4 (0x4), region = 96 }
 0x24b   :  { %817 = vsyncpa [#allocation4], 1 }
 0x24c   :  { %819 = vsyncpa [#allocation4 + $0x1], 1 }

</bundles_post_ra>
